<compile_context>
chip_gen: v7x
topology: tpu7x:2x2x1
jax: 0.10.0
libtpu: 0.0.40
codegen_flags: <defaults>
</compile_context>

<pallas_src>
import jax
import jax.numpy as jnp
from jax.experimental import pallas as pl
from jax.experimental.pallas import tpu as pltpu


# ---------------------------------------------------------------------------
# Primary (optimal) path: the module's forward is the identity.
# ---------------------------------------------------------------------------
def pass_through_seq2seq_encoder(inputs: jax.Array, mask: jax.Array) -> jax.Array:
    """Pallas-level equivalent of PassThroughSeq2SeqEncoder.forward.

    The PyTorch module returns `inputs` unchanged and ignores `mask`, so the
    optimal TPU implementation is simply to return the input array (zero copy,
    zero kernel launch).
    """
    del mask  # Ignored, exactly as in the PyTorch module.
    return inputs


# ---------------------------------------------------------------------------
# Optional: materialized-copy kernel (only if a distinct output buffer is
# genuinely required).  Pure HBM -> HBM DMA memcpy, no VMEM staging.
# ---------------------------------------------------------------------------
_MAX_CHUNKS = 8              # max concurrent DMAs (one semaphore each)
_MIN_CHUNK_BYTES = 1 << 20   # don't split below ~1 MiB per DMA


def _num_chunks(leading: int, total_bytes: int) -> int:
    """Largest divisor of `leading` that is <= _MAX_CHUNKS while keeping each
    chunk at least _MIN_CHUNK_BYTES (tiny arrays -> single DMA)."""
    best = 1
    for c in range(2, _MAX_CHUNKS + 1):
        if leading % c == 0 and total_bytes // c >= _MIN_CHUNK_BYTES:
            best = c
    return best


def _make_hbm_memcpy_kernel(n_chunks: int, chunk_rows: int):
    """Kernel: issue n_chunks contiguous HBM->HBM DMAs, then drain them."""

    def kernel(x_hbm, o_hbm, sems):
        copies = []
        for c in range(n_chunks):  # small static loop (<= _MAX_CHUNKS)
            start = c * chunk_rows
            cp = pltpu.make_async_copy(
                x_hbm.at[pl.ds(start, chunk_rows)],
                o_hbm.at[pl.ds(start, chunk_rows)],
                sems.at[c],
            )
            cp.start()
            copies.append(cp)
        for cp in copies:
            cp.wait()

    return kernel


def pass_through_seq2seq_encoder_materialized(inputs: jax.Array,
                                               mask: jax.Array) -> jax.Array:
    """Identity copy via Pallas: chunked HBM->HBM DMA, no VMEM round-trip.

    Note: if the caller can donate the input buffer, use the primary
    pass_through_seq2seq_encoder path instead (no copy at all).
    """
    del mask
    orig_shape = inputs.shape

    # DMA slicing needs at least one leading axis to chunk along.
    squeeze_back = False
    if inputs.ndim == 0:
        inputs = inputs.reshape(1)
        squeeze_back = True

    leading = inputs.shape[0]
    total_bytes = inputs.size * jnp.dtype(inputs.dtype).itemsize
    n_chunks = _num_chunks(leading, total_bytes)
    chunk_rows = leading // n_chunks

    cost = pl.CostEstimate(flops=0, transcendentals=0,
                           bytes_accessed=2 * total_bytes)

    out = pl.pallas_call(
        _make_hbm_memcpy_kernel(n_chunks, chunk_rows),
        out_shape=jax.ShapeDtypeStruct(inputs.shape, inputs.dtype),
        in_specs=[pl.BlockSpec(memory_space=pl.ANY)],   # stay in HBM
        out_specs=pl.BlockSpec(memory_space=pl.ANY),    # stay in HBM
        scratch_shapes=[pltpu.SemaphoreType.DMA((n_chunks,))],
        cost_estimate=cost,
    )(inputs)

    if squeeze_back:
        out = out.reshape(orig_shape)
    return out


if __name__ == "__main__":
    # PassThroughSeq2SeqEncoder(input_dim=32): no parameters to initialize.
    batch, seq_len, input_dim = 2, 8, 32

    key = jax.random.PRNGKey(0)
    k_x, k_m = jax.random.split(key)
    inputs = jax.random.normal(k_x, (batch, seq_len, input_dim), dtype=jnp.float32)
    mask = jax.random.bernoulli(k_m, 0.8, (batch, seq_len))

    # Primary (optimal) path: pure identity, no kernel launch.
    out = jax.block_until_ready(pass_through_seq2seq_encoder(inputs, mask))
    assert out.shape == inputs.shape
    assert out.dtype == inputs.dtype
    assert bool(jnp.array_equal(out, inputs))

    # Materialized-copy path (single whole-array HBM->HBM DMA at this size).
    out_copy = jax.block_until_ready(
        pass_through_seq2seq_encoder_materialized(inputs, mask))
    assert out_copy.shape == inputs.shape
    assert out_copy.dtype == inputs.dtype
    assert bool(jnp.array_equal(out_copy, inputs))

    # A modest second case that exercises the multi-chunk DMA path
    # (8 x 128 x 512 f32 = 2 MiB -> 2 concurrent HBM->HBM DMAs).
    k_x2, k_m2 = jax.random.split(k_x)
    big_inputs = jax.random.normal(k_x2, (8, 128, 512), dtype=jnp.float32)
    big_mask = jax.random.bernoulli(k_m2, 0.8, (8, 128))
    big_copy = jax.block_until_ready(
        pass_through_seq2seq_encoder_materialized(big_inputs, big_mask))
    assert big_copy.shape == big_inputs.shape
    assert big_copy.dtype == big_inputs.dtype
    assert bool(jnp.array_equal(big_copy, big_inputs))

    print("KERNEL_OK")
</pallas_src>

<mosaic_0001>
module attributes {stable_mosaic.version = 11 : i64} {
  func.func @kernel(%arg0: memref<2x8x32xf32, #tpu.memory_space<any>>, %arg1: memref<2x8x32xf32, #tpu.memory_space<any>>, %arg2: memref<1x!tpu.dma_semaphore, #tpu.memory_space<semaphore_mem>>) attributes {dimension_semantics = [], scalar_prefetch = 0 : i64, scratch_operands = 1 : i64, tpu.core_type = #tpu.core_type<tc>} {
    %c0_i32 = arith.constant 0 : i32
    %c0_i32_0 = arith.constant 0 : i32
    %c0_i32_1 = arith.constant 0 : i32
    %c0_i32_2 = arith.constant 0 : i32
    %0 = tpu.memref_slice %arg0[%c0_i32_0, %c0_i32_1, %c0_i32_2] : memref<2x8x32xf32, #tpu.memory_space<any>> -> memref<2x8x32xf32, #tpu.memory_space<any>>
    %c0_i32_3 = arith.constant 0 : i32
    %c0_i32_4 = arith.constant 0 : i32
    %c0_i32_5 = arith.constant 0 : i32
    %1 = tpu.memref_slice %arg1[%c0_i32_3, %c0_i32_4, %c0_i32_5] : memref<2x8x32xf32, #tpu.memory_space<any>> -> memref<2x8x32xf32, #tpu.memory_space<any>>
    %2 = tpu.memref_slice %arg2[%c0_i32] : memref<1x!tpu.dma_semaphore, #tpu.memory_space<semaphore_mem>> -> memref<1x!tpu.dma_semaphore, #tpu.memory_space<semaphore_mem>>
    %3 = tpu.memref_squeeze %2 : memref<1x!tpu.dma_semaphore, #tpu.memory_space<semaphore_mem>> -> memref<!tpu.dma_semaphore, #tpu.memory_space<semaphore_mem>>
    tpu.enqueue_dma source(%0 : memref<2x8x32xf32, #tpu.memory_space<any>>) target(%1 : memref<2x8x32xf32, #tpu.memory_space<any>>) target_semaphore(%3 : memref<!tpu.dma_semaphore, #tpu.memory_space<semaphore_mem>>)
    %c0_i32_6 = arith.constant 0 : i32
    %c0_i32_7 = arith.constant 0 : i32
    %c0_i32_8 = arith.constant 0 : i32
    %c0_i32_9 = arith.constant 0 : i32
    %4 = tpu.memref_slice %arg0[%c0_i32_7, %c0_i32_8, %c0_i32_9] : memref<2x8x32xf32, #tpu.memory_space<any>> -> memref<2x8x32xf32, #tpu.memory_space<any>>
    %c0_i32_10 = arith.constant 0 : i32
    %c0_i32_11 = arith.constant 0 : i32
    %c0_i32_12 = arith.constant 0 : i32
    %5 = tpu.memref_slice %arg1[%c0_i32_10, %c0_i32_11, %c0_i32_12] : memref<2x8x32xf32, #tpu.memory_space<any>> -> memref<2x8x32xf32, #tpu.memory_space<any>>
    %6 = tpu.memref_slice %arg2[%c0_i32_6] : memref<1x!tpu.dma_semaphore, #tpu.memory_space<semaphore_mem>> -> memref<1x!tpu.dma_semaphore, #tpu.memory_space<semaphore_mem>>
    %7 = tpu.memref_squeeze %6 : memref<1x!tpu.dma_semaphore, #tpu.memory_space<semaphore_mem>> -> memref<!tpu.dma_semaphore, #tpu.memory_space<semaphore_mem>>
    tpu.wait_dma2 semaphore(%7 : memref<!tpu.dma_semaphore, #tpu.memory_space<semaphore_mem>>) src(%4 : memref<2x8x32xf32, #tpu.memory_space<any>>) dst(%5 : memref<2x8x32xf32, #tpu.memory_space<any>>)
    return
  }
}

</mosaic_0001>

<bundles_post_ra>
// kernel: tpu_custom_call.1
= control target key start
LH: loop header
LB: loop body
LE: loop exit
PB: predicated region body
PF: predicated region fallthrough
CT: control target
= control target key end

     0   :  { %s35_s6 = smov [#allocation2]   ;;  %s36_s7 = smov [#allocation3]   ;;  %s54_s0 = inlined_call_operand.hbm [shape: f32[2,8,32], index: 0, kind: input, shape index: {}]   ;;  %s55_s1 = inlined_call_operand.hbm [shape: f32[2,8,32], index: 1, kind: output, shape index: {}]  }
   0x1   :  { %s37_s8 = smov 0  }
   0x2   :  { %18 = dma.general %s54_s0, 256, %s55_s1, %s35_s6, %s36_s7, [#allocation4], %s37_s8, 0  }
   0x3   :  { %33 = dma.done.wait [#allocation2], 256 }
   0x4   :  { %34 = vsyncadd [#allocation2], 4294967040 }
   0x5   :  { %23 = vsyncmov [#allocation2] }
   0x8   :  { %s24_s13 = vpop.sfrf %23 }
   0x9   :  { %p29_p0 = scmp.ne.s32.totalorder %s24_s13, 0 }
   0xb   :  { %28 = shalt.err (%p29_p0)  }

</bundles_post_ra>
